<compile_context>
chip_gen: v7x
topology: tpu7x:2x2x1
jax: 0.10.0
libtpu: 0.0.40
codegen_flags: <defaults>
</compile_context>

<pallas_src>
import functools

import jax
import jax.numpy as jnp
from jax.experimental import pallas as pl
from jax.experimental.pallas import tpu as pltpu


def _vq_kernel(x_ref, e_ref, esq_ref, q_ref, idx_ref, sse_ref,
               *, n_pb: int, tile_n: int):
    """One (batch, N-tile) step of vector quantization, lane-dense on N."""
    x = x_ref[...]          # [D, TN] f32
    e = e_ref[...]          # [K, D]  f32 (resident codebook)
    e_sq = esq_ref[...]     # [K, 1]  f32 (resident ||e_k||^2, hoisted)
    k = e.shape[0]

    # scores[k, n] = ||e_k||^2 - 2 * e_k . x_n  (same argmin as full distance;
    # the per-column constant ||x_n||^2 is dropped).
    ex = jax.lax.dot_general(e, x, (((1,), (0,)), ((), ())),
                             preferred_element_type=jnp.float32)     # [K, TN]
    scores = e_sq - 2.0 * ex

    # argmin over the codebook (sublane) axis, first-occurrence tie-break.
    min_s = jnp.min(scores, axis=0, keepdims=True)                   # [1, TN]
    row = jax.lax.broadcasted_iota(jnp.int32, scores.shape, 0)       # [K, TN]
    idx = jnp.min(jnp.where(scores == min_s, row, k),
                  axis=0, keepdims=True)                             # [1, TN]
    enc = (row == idx).astype(jnp.float32)                           # [K, TN]

    # quantized = E^T @ one_hot  -> [D, TN]  (no explicit transpose needed).
    quant = jax.lax.dot_general(e, enc, (((0,), (0,)), ((), ())),
                                preferred_element_type=jnp.float32)  # [D, TN]

    # Straight-through estimator is the identity at value level (forward).
    q_ref[...] = quant.astype(q_ref.dtype)
    idx_ref[...] = idx.astype(jnp.int32)

    # Per-tile partial sum of squared error; masked on the ragged last tile
    # (n_pb / tile_n are static, so the branch resolves at trace time).
    diff = quant - x
    diff_sq = diff * diff
    if n_pb % tile_n != 0:
        col = pl.program_id(1) * tile_n + jax.lax.broadcasted_iota(
            jnp.int32, (1, tile_n), 1)
        diff_sq = jnp.where(col < n_pb, diff_sq, 0.0)
    sse_ref[...] = jnp.full((1, 128), jnp.sum(diff_sq), dtype=jnp.float32)


def _choose_tile_n(n_pb, d, k, tile_n, vmem_budget_bytes=16 * 1024 * 1024):
    """Largest 128-multiple tile whose per-step VMEM footprint fits the budget."""
    def pad8(v):
        return -(-v // 8) * 8
    # Per-column f32 bytes: double-buffered x + quant blocks, double-buffered
    # int32 idx block (padded to 8 sublanes), plus ex/scores/enc intermediates.
    per_col = 4 * (4 * pad8(d) + 2 * 8 + 3 * pad8(k))
    cap = max(128, (vmem_budget_bytes // per_col) // 128 * 128)
    tn = min(max(128, (int(tile_n) // 128) * 128), cap)
    return n_pb if n_pb <= tn else tn


def _run_vq(x_bcn, embedding, tile_n):
    """x_bcn: [B, D, N_pb] channel-first input.

    Returns (quantized [B,D,N_pb], indices [B,1,N_pb] int32, sse partials).
    """
    b, d, n_pb = x_bcn.shape
    k = embedding.shape[0]

    tn = _choose_tile_n(n_pb, d, k, tile_n)
    g = pl.cdiv(n_pb, tn)

    # Hoist ||e||^2 out of the kernel (loop-invariant).
    e_sq = jnp.sum(embedding * embedding, axis=1, keepdims=True)     # [K, 1]

    kernel = functools.partial(_vq_kernel, n_pb=n_pb, tile_n=tn)

    n = b * n_pb
    flops = 4 * n * k * d + 8 * n * k
    bytes_accessed = 4 * (2 * d * n + n + k * d + k + b * g * 128)

    q, idx, sse_part = pl.pallas_call(
        kernel,
        grid_spec=pltpu.PrefetchScalarGridSpec(
            num_scalar_prefetch=0,
            grid=(b, g),
            in_specs=[
                # x tile, channel-first, no wrapper transpose.
                pl.BlockSpec((pl.Squeezed(), d, tn), lambda bb, i: (bb, 0, i)),
                # codebook (resident across the whole grid).
                pl.BlockSpec((k, d), lambda bb, i: (0, 0)),
                # ||e||^2 (resident).
                pl.BlockSpec((k, 1), lambda bb, i: (0, 0)),
            ],
            out_specs=(
                pl.BlockSpec((pl.Squeezed(), d, tn), lambda bb, i: (bb, 0, i)),
                pl.BlockSpec((pl.Squeezed(), 1, tn), lambda bb, i: (bb, 0, i)),
                pl.BlockSpec((pl.Squeezed(), pl.Squeezed(), 1, 128),
                             lambda bb, i: (bb, i, 0, 0)),
            ),
        ),
        out_shape=(
            jax.ShapeDtypeStruct((b, d, n_pb), jnp.float32),
            jax.ShapeDtypeStruct((b, 1, n_pb), jnp.int32),
            jax.ShapeDtypeStruct((b, g, 1, 128), jnp.float32),
        ),
        compiler_params=pltpu.CompilerParams(
            # Fully parallel grid: per-tile partial sums keep the N axis free
            # of accumulation, so v7x megacore can split B and N.
            dimension_semantics=("parallel", "parallel"),
            # v5e scoped default is only 16 MiB; 48 MiB is safe on all gens
            # (below v7x's 64 MiB physical per TensorCore).
            vmem_limit_bytes=48 * 1024 * 1024,
        ),
        cost_estimate=pl.CostEstimate(flops=flops, transcendentals=0,
                                      bytes_accessed=bytes_accessed),
    )(x_bcn, embedding, e_sq)
    return q, idx, sse_part


def improved_vector_quantizer_forward(inputs, embedding, commitment_cost,
                                      *, tile_n=8192):
    """Mirrors ImprovedVectorQuantizer.forward (eval mode).

    inputs: [B, C, L] or [B, C, H, W] (channel-first), C == embedding_dim.
    embedding: [num_embeddings, embedding_dim]
    returns (loss, quantized, perplexity, encodings)
    """
    inputs = inputs.astype(jnp.float32)
    embedding = embedding.astype(jnp.float32)
    k, d = embedding.shape
    orig_shape = inputs.shape

    if inputs.ndim == 3:
        b, c, n_pb = inputs.shape
        x_bcn = inputs                                   # [B, C, L]
    else:
        b, c, h, w = inputs.shape
        n_pb = h * w
        x_bcn = inputs.reshape(b, c, n_pb)               # free, contiguous
    assert c == d, "channel dim must equal embedding_dim"

    q_bcn, idx_b1n, sse_part = _run_vq(x_bcn, embedding, tile_n)

    n = b * n_pb
    # loss = commitment_cost * MSE(quantized, inputs) (module returns only the
    # commitment term; codebook is trained via EMA, not a loss term).
    e_latent_loss = jnp.sum(sse_part[:, :, 0, 0]) / jnp.float32(n * d)
    loss = jnp.float32(commitment_cost) * e_latent_loss

    # Encodings [N, K]: row order b-major then spatial -> matches the torch
    # permute(0,2,[3,]1).view(-1, D) flattening.
    idx_flat = idx_b1n.reshape(n)
    encodings = jax.nn.one_hot(idx_flat, k, dtype=jnp.float32)

    avg_probs = jnp.mean(encodings, axis=0)
    perplexity = jnp.exp(-jnp.sum(avg_probs * jnp.log(avg_probs + 1e-10)))

    quantized = q_bcn.reshape(orig_shape)                # already channel-first
    return loss, quantized, perplexity, encodings


def _reference_forward(inputs, embedding, commitment_cost):
    """Pure-JAX reference mirroring the PyTorch module (eval mode)."""
    if inputs.ndim == 3:
        x_cl = jnp.transpose(inputs, (0, 2, 1))
    else:
        x_cl = jnp.transpose(inputs, (0, 2, 3, 1))
    d = embedding.shape[1]
    flat = x_cl.reshape(-1, d)
    dist = (jnp.sum(flat ** 2, 1, keepdims=True)
            + jnp.sum(embedding ** 2, 1)
            - 2.0 * flat @ embedding.T)
    idx = jnp.argmin(dist, axis=1)
    enc = jax.nn.one_hot(idx, embedding.shape[0], dtype=jnp.float32)
    quant = (enc @ embedding).reshape(x_cl.shape)
    loss = commitment_cost * jnp.mean((quant - x_cl) ** 2)
    avg = jnp.mean(enc, axis=0)
    ppl = jnp.exp(-jnp.sum(avg * jnp.log(avg + 1e-10)))
    if inputs.ndim == 3:
        quant = jnp.transpose(quant, (0, 2, 1))
    else:
        quant = jnp.transpose(quant, (0, 3, 1, 2))
    return loss, quant, ppl, enc


if __name__ == "__main__":
    num_embeddings = 32
    embedding_dim = 4
    commitment_cost = 0.25

    key = jax.random.PRNGKey(0)
    k_emb, k_x4, k_x3 = jax.random.split(key, 3)

    # nn.Embedding(num_embeddings, embedding_dim).weight.data.normal_()
    embedding = jax.random.normal(k_emb, (num_embeddings, embedding_dim),
                                  dtype=jnp.float32)

    # 4-D (NCHW) path: per-batch N = 256, tile 128 -> grid (2, 2).
    x4 = jax.random.normal(k_x4, (2, embedding_dim, 16, 16), dtype=jnp.float32)
    loss, quantized, perplexity, encodings = improved_vector_quantizer_forward(
        x4, embedding, commitment_cost, tile_n=128)
    jax.block_until_ready((loss, quantized, perplexity, encodings))

    r_loss, r_q, r_ppl, r_enc = _reference_forward(x4, embedding, commitment_cost)
    assert jnp.allclose(loss, r_loss, atol=1e-5), (loss, r_loss)
    assert jnp.allclose(quantized, r_q, atol=1e-5)
    assert jnp.allclose(perplexity, r_ppl, atol=1e-4)
    assert jnp.allclose(encodings, r_enc)

    # Same input with the default (large, VMEM-capped) tile -> single tile per
    # batch, block last dim equals the full array dim.
    loss_d, q_d, ppl_d, enc_d = improved_vector_quantizer_forward(
        x4, embedding, commitment_cost)
    jax.block_until_ready((loss_d, q_d, ppl_d, enc_d))
    assert jnp.allclose(loss_d, r_loss, atol=1e-5)
    assert jnp.allclose(q_d, r_q, atol=1e-5)
    assert jnp.allclose(ppl_d, r_ppl, atol=1e-4)
    assert jnp.allclose(enc_d, r_enc)

    # 3-D (NCL) path with per-batch N = 200 and tile 128: exercises the ragged
    # last tile (masked SSE partials, clamped edge-block writeback).
    x3 = jax.random.normal(k_x3, (2, embedding_dim, 200), dtype=jnp.float32)
    loss3, q3, ppl3, enc3 = improved_vector_quantizer_forward(
        x3, embedding, commitment_cost, tile_n=128)
    jax.block_until_ready((loss3, q3, ppl3, enc3))

    r_loss3, r_q3, r_ppl3, r_enc3 = _reference_forward(x3, embedding,
                                                       commitment_cost)
    assert jnp.allclose(loss3, r_loss3, atol=1e-5), (loss3, r_loss3)
    assert jnp.allclose(q3, r_q3, atol=1e-5)
    assert jnp.allclose(ppl3, r_ppl3, atol=1e-4)
    assert jnp.allclose(enc3, r_enc3)

    print("KERNEL_OK")
</pallas_src>

<mosaic_0001>
module attributes {stable_mosaic.version = 11 : i64} {
  func.func @_vq_kernel(%arg0: i32, %arg1: i32, %arg2: memref<1x4x128xf32, #tpu.memory_space<vmem>>, %arg3: memref<32x4xf32, #tpu.memory_space<vmem>>, %arg4: memref<32x1xf32, #tpu.memory_space<vmem>>, %arg5: memref<1x4x128xf32, #tpu.memory_space<vmem>>, %arg6: memref<1x1x128xi32, #tpu.memory_space<vmem>>, %arg7: memref<1x1x1x128xf32, #tpu.memory_space<vmem>>) attributes {dimension_semantics = [#tpu.dimension_semantics<parallel>, #tpu.dimension_semantics<parallel>], iteration_bounds = array<i64: 2, 2>, scalar_prefetch = 0 : i64, scratch_operands = 0 : i64, tpu.core_type = #tpu.core_type<tc>, window_params = [{transform_indices = @transform_0, window_bounds = array<i64: 1, 4, 128>}, {pipeline_mode = #tpu.pipeline_mode<synchronous>, transform_indices = @transform_1, window_bounds = array<i64: 32, 4>}, {pipeline_mode = #tpu.pipeline_mode<synchronous>, transform_indices = @transform_2, window_bounds = array<i64: 32, 1>}, {transform_indices = @transform_3, window_bounds = array<i64: 1, 4, 128>}, {transform_indices = @transform_4, window_bounds = array<i64: 1, 1, 128>}, {transform_indices = @transform_5, window_bounds = array<i64: 1, 1, 1, 128>}]} {
    %c0 = arith.constant 0 : index
    %c0_0 = arith.constant 0 : index
    %c0_1 = arith.constant 0 : index
    %0 = vector.load %arg2[%c0, %c0_0, %c0_1] : memref<1x4x128xf32, #tpu.memory_space<vmem>>, vector<1x4x128xf32>
    %1 = vector.shape_cast %0 : vector<1x4x128xf32> to vector<4x128xf32>
    %c0_2 = arith.constant 0 : index
    %c0_3 = arith.constant 0 : index
    %2 = vector.load %arg3[%c0_2, %c0_3] : memref<32x4xf32, #tpu.memory_space<vmem>>, vector<32x4xf32>
    %c0_4 = arith.constant 0 : index
    %c0_5 = arith.constant 0 : index
    %3 = vector.load %arg4[%c0_4, %c0_5] : memref<32x1xf32, #tpu.memory_space<vmem>>, vector<32x1xf32>
    %cst = arith.constant dense<0.000000e+00> : vector<32x128xf32>
    %4 = tpu.matmul %2, %1, %cst {dimension_numbers = #tpu.dot_dimension_numbers<[1], [0], [0], [1], [0, 0, 1, 1], [], []>} : vector<32x4xf32>, vector<4x128xf32>, vector<32x128xf32> -> vector<32x128xf32>
    %cst_6 = arith.constant 2.000000e+00 : f32
    %5 = vector.broadcast %cst_6 : f32 to vector<32x128xf32>
    %6 = arith.mulf %5, %4 : vector<32x128xf32>
    %7 = vector.broadcast %3 : vector<32x1xf32> to vector<32x128xf32>
    %8 = arith.subf %7, %6 : vector<32x128xf32>
    %cst_7 = arith.constant dense<0x7F800000> : vector<128xf32>
    %9 = vector.multi_reduction <minimumf>, %8, %cst_7 [0] : vector<32x128xf32> to vector<128xf32>
    %10 = vector.shape_cast %9 : vector<128xf32> to vector<1x128xf32>
    %11 = tpu.iota {dimensions = array<i32: 0>} : vector<32x128xi32>
    %12 = vector.broadcast %10 : vector<1x128xf32> to vector<32x128xf32>
    %13 = arith.cmpf oeq, %8, %12 : vector<32x128xf32>
    %c32_i32 = arith.constant 32 : i32
    %14 = vector.broadcast %c32_i32 : i32 to vector<32x128xi32>
    %15 = arith.select %13, %11, %14 : vector<32x128xi1>, vector<32x128xi32>
    %cst_8 = arith.constant dense<2147483647> : vector<128xi32>
    %16 = vector.multi_reduction <minsi>, %15, %cst_8 [0] : vector<32x128xi32> to vector<128xi32>
    %17 = vector.shape_cast %16 : vector<128xi32> to vector<1x128xi32>
    %18 = vector.broadcast %17 : vector<1x128xi32> to vector<32x128xi32>
    %19 = arith.cmpi eq, %11, %18 : vector<32x128xi32>
    %20 = arith.extui %19 : vector<32x128xi1> to vector<32x128xi32>
    %21 = arith.sitofp %20 : vector<32x128xi32> to vector<32x128xf32>
    %cst_9 = arith.constant dense<0.000000e+00> : vector<4x128xf32>
    %22 = tpu.matmul %2, %21, %cst_9 {dimension_numbers = #tpu.dot_dimension_numbers<[0], [0], [1], [1], [0, 1, 1, 1], [], []>} : vector<32x4xf32>, vector<32x128xf32>, vector<4x128xf32> -> vector<4x128xf32>
    %c0_10 = arith.constant 0 : index
    %c0_11 = arith.constant 0 : index
    %c0_12 = arith.constant 0 : index
    %23 = vector.load %arg5[%c0_10, %c0_11, %c0_12] : memref<1x4x128xf32, #tpu.memory_space<vmem>>, vector<1x4x128xf32>
    %24 = vector.shape_cast %23 : vector<1x4x128xf32> to vector<4x128xf32>
    %25 = vector.shape_cast %22 : vector<4x128xf32> to vector<1x4x128xf32>
    tpu.vector_store %arg5[%c0_10, %c0_11, %c0_12], %25 {strides = array<i32>} : memref<1x4x128xf32, #tpu.memory_space<vmem>>, vector<1x4x128xf32>,
    %c0_13 = arith.constant 0 : index
    %c0_14 = arith.constant 0 : index
    %c0_15 = arith.constant 0 : index
    %26 = vector.load %arg6[%c0_13, %c0_14, %c0_15] : memref<1x1x128xi32, #tpu.memory_space<vmem>>, vector<1x1x128xi32>
    %27 = vector.shape_cast %26 : vector<1x1x128xi32> to vector<1x128xi32>
    %28 = vector.shape_cast %17 : vector<1x128xi32> to vector<1x1x128xi32>
    tpu.vector_store %arg6[%c0_13, %c0_14, %c0_15], %28 {strides = array<i32>} : memref<1x1x128xi32, #tpu.memory_space<vmem>>, vector<1x1x128xi32>,
    %29 = arith.subf %22, %1 : vector<4x128xf32>
    %30 = arith.mulf %29, %29 : vector<4x128xf32>
    %31 = vector.shape_cast %30 : vector<4x128xf32> to vector<1x4x128xf32>
    %cst_16 = arith.constant dense<0.000000e+00> : vector<1xf32>
    %32 = vector.multi_reduction <add>, %31, %cst_16 [1, 2] : vector<1x4x128xf32> to vector<1xf32>
    %33 = vector.shape_cast %32 : vector<1xf32> to vector<1x1x1xf32>
    %34 = vector.extract %33[0, 0, 0] : f32 from vector<1x1x1xf32>
    %35 = vector.broadcast %34 : f32 to vector<1x128xf32>
    %c0_17 = arith.constant 0 : index
    %c0_18 = arith.constant 0 : index
    %c0_19 = arith.constant 0 : index
    %c0_20 = arith.constant 0 : index
    %36 = vector.load %arg7[%c0_17, %c0_18, %c0_19, %c0_20] : memref<1x1x1x128xf32, #tpu.memory_space<vmem>>, vector<1x1x1x128xf32>
    %37 = vector.shape_cast %36 : vector<1x1x1x128xf32> to vector<1x128xf32>
    %38 = vector.shape_cast %35 : vector<1x128xf32> to vector<1x1x1x128xf32>
    tpu.vector_store %arg7[%c0_17, %c0_18, %c0_19, %c0_20], %38 {strides = array<i32>} : memref<1x1x1x128xf32, #tpu.memory_space<vmem>>, vector<1x1x1x128xf32>,
    return
  }
  func.func @transform_0(%arg0: i32, %arg1: i32) -> (i32, i32, i32) {
    %c0_i32 = arith.constant 0 : i32
    %c0_i32_0 = arith.constant 0 : i32
    return %arg0, %c0_i32, %arg1 : i32, i32, i32
  }
  func.func @transform_1(%arg0: i32, %arg1: i32) -> (i32, i32) {
    %c0_i32 = arith.constant 0 : i32
    %c0_i32_0 = arith.constant 0 : i32
    %c0_i32_1 = arith.constant 0 : i32
    return %c0_i32, %c0_i32_0 : i32, i32
  }
  func.func @transform_2(%arg0: i32, %arg1: i32) -> (i32, i32) {
    %c0_i32 = arith.constant 0 : i32
    %c0_i32_0 = arith.constant 0 : i32
    %c0_i32_1 = arith.constant 0 : i32
    return %c0_i32, %c0_i32_0 : i32, i32
  }
  func.func @transform_3(%arg0: i32, %arg1: i32) -> (i32, i32, i32) {
    %c0_i32 = arith.constant 0 : i32
    %c0_i32_0 = arith.constant 0 : i32
    return %arg0, %c0_i32, %arg1 : i32, i32, i32
  }
  func.func @transform_4(%arg0: i32, %arg1: i32) -> (i32, i32, i32) {
    %c0_i32 = arith.constant 0 : i32
    %c0_i32_0 = arith.constant 0 : i32
    return %arg0, %c0_i32, %arg1 : i32, i32, i32
  }
  func.func @transform_5(%arg0: i32, %arg1: i32) -> (i32, i32, i32, i32) {
    %c0_i32 = arith.constant 0 : i32
    %c0_i32_0 = arith.constant 0 : i32
    %c0_i32_1 = arith.constant 0 : i32
    return %arg0, %arg1, %c0_i32, %c0_i32_0 : i32, i32, i32, i32
  }
}

</mosaic_0001>

<bundles_post_ra>
// kernel: tpu_custom_call.1
= control target key start
LH: loop header
LB: loop body
LE: loop exit
PB: predicated region body
PF: predicated region fallthrough
CT: control target
= control target key end

     0   :  { %s1369_s0 = inlined_call_operand.vmem [shape: f32[2,4,256], index: 0, kind: input, shape index: {}]   ;;  %s1370_s1 = inlined_call_operand.vmem [shape: f32[32,4], index: 1, kind: input, shape index: {}]   ;;  %s1371_s2 = inlined_call_operand.vmem [shape: f32[32,1], index: 2, kind: input, shape index: {}]   ;;  %s1372_s3 = inlined_call_operand.hbm [shape: f32[2,4,256], index: 3, kind: output, shape index: {0}]   ;;  %s1373_s4 = inlined_call_operand.hbm [shape: s32[2,1,256], index: 4, kind: output, shape index: {1}]   ;;  %s1374_s5 = inlined_call_operand.hbm [shape: f32[2,2,1,128], index: 5, kind: output, shape index: {2}]  }
   0x1   :  { %1379 = sst [smem:[#allocation10_spill]] %s1369_s0 }
   0x2   :  { %1380 = sst [smem:[#allocation11_spill]] %s1370_s1 }
   0x3   :  { %11 = vsyncpa [#allocation3], 0 }
   0x4   :  { %13 = vsyncpa [#allocation3 + $0x1], 0 }
   0x5   :  { %14 = vsyncpa [#allocation5], 0 }
   0x6   :  { %16 = vsyncpa [#allocation5 + $0x1], 0  ;;  %s1117_s18 = smov 0   ;;  %s1119_s19 = smov 0  }
   0x7   :  { %s1121_s20 = smov 0   ;;  %s1123_s21 = smov 0  }
   0x8   :  { %s1125_s22 = smov 0   ;;  %s1127_s23 = smov 0  }
   0x9   :  { %s1129_s24 = smov 0   ;;  %s1131_s25 = smov 0  }
   0xa LB: > { %s1376_s26 = sadd.s32 4294967295, %s1077_s25   ;;  %s1375_s27 = sadd.s32 4294967294, %s1077_s25   ;;  %s1077_s25 = sphi %s1131_s25, %s22_s25   ;;  %s1073_s24 = sphi %s1129_s24, %s1396_s24   ;;  %s1069_s23 = sphi %s1127_s23, %s1395_s23   ;;  %s1065_s22 = sphi %s1125_s22, %s1394_s22   ;;  %s1061_s21 = sphi %s1123_s21, %s1393_s21   ;;  %s1057_s20 = sphi %s1121_s20, %s1392_s20   ;;  %s1053_s19 = sphi %s1119_s19, %s1391_s19   ;;  %s1049_s18 = sphi %s1117_s18, %s1390_s18  }
   0xb   : > { %s31_s28 = sadd.s32 1, %s1069_s23  ;;  %s34_s29 = sadd.s32 1, %s1073_s24 }
   0xc   : > { %p32_p0 = scmp.ge.s32.totalorder %s31_s28, 2  ;;  %p123_p1 = scmp.ne.s32.totalorder %s1057_s20, %s1053_s19 }
   0xd   : > { %p124_p2 = scmp.eq.s32.totalorder %s1376_s26, 3  ;;  %p129_p5 = scmp.ne.s32.totalorder %s1053_s19, %s1049_s18 }
   0xe   : > { %s1398_s28 = smov (%p32_p0, %s31_s28), 0  ;;  %s1400_s29 = smov (!%p32_p0, %s34_s29), %s1073_s24 }
   0xf   : > { %s109_s30 = ssub.s32 %s1069_s23, %s1398_s28  ;;  %p1170_p3 = por %p124_p2, %p123_p1 }
  0x10   : > { %p36_p4 = scmp.ge.s32.totalorder %s1400_s29, 2  ;;  %p130_p6 = scmp.eq.s32.totalorder %s1375_s27, 3 }
  0x11   : > { %p771_p7 = scmp.ge.s32.totalorder %s1077_s25, 1  ;;  %p221_p9 = scmp.lt.s32.totalorder %s1077_s25, 5 }
  0x12   : > { %s1402_s29 = smov (%p36_p4, %s1400_s29), 0  ;;  %p1181_p8 = por %p130_p6, %p129_p5 }
  0x13   : > { %1382 = sst [smem:[#allocation9_spill]] %s1402_s29  ;;  %s108_s8 = ssub.s32 %s1073_s24, %s1402_s29 }
  0x14   : > { %s113_s9 = sadd.s32 1, %s1057_s20  ;;  %s110_s10 = sor.u32 %s109_s30, %s108_s8 }
  0x15   : > { %p222_p10 = pnand %p771_p7, %p221_p9  ;;  %p111_p11 = scmp.eq.s32.totalorder %s110_s10, 0 }
  0x16   : > { %p260_p12 = scmp.lt.s32.totalorder (!%p222_p10), %s1065_s22, 1  ;;  %p262_p13 = scmp.lt.s32.totalorder (!%p222_p10), %s1061_s21, 1  ;;  %vm277_vm0 = vcmask (!%p222_p10), 31744   ;;  %v273_v1 = vld [vmem:[%s1371_s2] sm:$0xff] (!%p222_p10)  ;;  %v1079_v2 = vmov (!%p222_p10), 0   ;;  %v275_v3 = vld [vmem:[%s1371_s2 + $0x10] sm:$0xff] (!%p222_p10)  ;;  %v416_v32 = vlaneseq (!%p222_p10) }
  0x17   : > { %s1190_s11 = scalar_select %p111_p11, %s1057_s20, %s113_s9  }
  0x18   : > { %225 = sbr.rel (%p222_p10) target bundleno = 740 (0x2e4), region = 32  ;;  %s1384_s1 = sld [smem:[#allocation11_spill]] (!%p222_p10)  ;;  %921 = vset.pattern.permute.xlu0 (!%p222_p10), %v1079_v2  ;;  %922 = vset.pattern.permute.xlu1 (!%p222_p10), %v1079_v2  ;;  %v274_v4 = vld [vmem:[%s1371_s2 + $0x8] sm:$0xff] (!%p222_p10)  ;;  %v276_v5 = vld [vmem:[%s1371_s2 + $0x18] sm:$0xff] (!%p222_p10)  ;;  %vm290_vm1 = vcmask (!%p222_p10), 1043456   ;;  %v1080_v10 = vmov (!%p222_p10), 0.0|0.0  }
  0x19   : > { %385 = vperm.xlu0 (!%p222_p10), %921, %v273_v1   ;;  %395 = vperm.xlu1 (!%p222_p10), %922, %v275_v3   ;;  %s1385_s0 = sld [smem:[#allocation10_spill]] (!%p222_p10)  ;;  %vm1081_vm2 = vmmov (!%p222_p10), 0   ;;  %v1082_v11 = vmov (!%p222_p10), 0.0   ;;  %v417_v35 = vshrl.u32 (!%p222_p10), %v416_v32, 7  ;;  %v1083_v55 = vmov (!%p222_p10), 1.0|1.0  }
  0x1a   : > { %827 = vmatprep.subr.bf16.mxu1 (!%p222_p10), %v1080_v10  ;;  %824 = vmatprep.mubr.msk.f32.mxu1 (!%p222_p10), %vm1081_vm2, %v1082_v11 }
  0x1b   : > { %v419_v38 = vadd.s32 (!%p222_p10), 16, %v417_v35  ;;  %v420_v39 = vadd.s32 (!%p222_p10), 24, %v417_v35  ;;  %v418_v40 = vadd.s32 (!%p222_p10), 8, %v417_v35 }
  0x1d   : > { %390 = vperm.xlu0 (!%p222_p10), %921, %v274_v4   ;;  %400 = vperm.xlu1 (!%p222_p10), %922, %v276_v5  }
  0x1e   : > { %v269_v0 = vld [vmem:[%s1384_s1] sm:$0xff] (!%p222_p10)  ;;  %v270_v7 = vld [vmem:[%s1384_s1 + $0x8] sm:$0xff] (!%p222_p10)  ;;  %v271_v8 = vld [vmem:[%s1384_s1 + $0x10] sm:$0xff] (!%p222_p10) }
  0x1f   : > { %810 = vmatprep.mubr.msk.f32.mxu0 %vm277_vm0, %v269_v0  ;;  %s261_s16 = scalar_select %p260_p12, %s1065_s22, 1  ;;  %v272_v9 = vld [vmem:[%s1384_s1 + $0x18] sm:$0xff] }
  0x20   : > { %s263_s8 = scalar_select %p262_p13, %s1061_s21, 1 }
  0x21   : > { %s773_s9 = sshll.u32 %s261_s16, 1 }
  0x22   : > { %s265_s14 = sadd.s32 %s773_s9, %s263_s8  ;;  %s1235_s8 = sand.u32 1, %s1053_s19  }
  0x23   : > { %s774_s15 = sshll.u32 %s265_s14, 2  ;;  %s253_s9 = scalar_lea.vmem [#allocation4], %s1235_s8 }
  0x24   : > { %s267_s17 = scalar_lea.vmem %s1385_s0, %s774_s15  ;;  %s772_s12 = sshll.u32 %s1235_s8, 2 }
  0x25   : > { %v1215_v6 = vld [vmem:[%s267_s17] sm:$0xf]  ;;  %s1240_s13 = scalar_lea.vmem [#allocation2], %s772_s12  ;;  %s790_s14 = sshll.u32 %s1065_s22, 1 }
  0x26   : > { %808 = vmatprep.subr.msk.mxu0 %vm290_vm1, %v1215_v6  ;;  %s1247_s15 = sadd.s32 %s1061_s21, %s790_s14  ;;  %s1386_s17 = sadd.s32 4294967295, %s1077_s25  }
  0x27   : > { %809 = vmatpush3.msk.msra.mxu0 %vm290_vm1, %v1215_v6  ;;  %s1251_s16 = sand.u32 1, %s1386_s17   ;;  %s1378_s30 = sshll.u32 %s1247_s15, 4 }
  0x28   : > { %811 = vmatmul.mubr.msk.f32.vlgmr.msra.gmra.mrb[0].mxu0 %vm277_vm0, %v270_v7  ;;  %s1259_s26 = scalar_lea.hbm %s1373_s4, %s1378_s30  ;;  %s617_s29 = sshll.u32 %s253_s9, 4  ;;  %s618_s29 = int_to_ptr.vmem [resolvable:$true] %s617_s29 }
  0x29   : > { %813 = vmatprep.mubr.msk.f32.mxu0 %vm277_vm0, %v271_v8  ;;  %s584_s12 = scalar_lea.sflag [#allocation5], %s1251_s16  ;;  %s923_s0 = scalar_lea.vmem %s618_s29, 16 }
  0x2a   : > { %p924_p0 = scmp.ne.s32.totalorder %s618_s29, %s923_s0  ;;  %s1084_s21 = smov [#allocation4]  }
  0x2b   : > { %s927_s22 = sshll.u32 %s1084_s21, 4  ;;  %s928_s22 = int_to_ptr.vmem [resolvable:$false] %s927_s22 }
  0x2c   : > { %814 = vmatmul.mubr.msk.f32.gmra.mrb[2].mxu0 %vm277_vm0, %v272_v9  ;;  %p925_p1 = pnand %p924_p0, %p1170_p3  ;;  %s929_s14 = scalar_lea.vmem %s928_s22, 32 }
  0x2d   : > { %p930_p4 = scmp.lt.s32.totalorder %s618_s29, %s928_s22  ;;  %p931_p5 = scmp.lt.s32.totalorder %s929_s14, %s923_s0 }
  0x2e   : > { %p926_p2 = pneg %p925_p1 }
  0x2f   : > { %p932_p6 = por %p931_p5, %p930_p4 }
  0x31   : > { %p933_p7 = pnand %p932_p6, %p926_p2 }
  0x3b   : > { %456 = vxpose.xlu0.b32.start [1/4] (short) (narrow) %v269_v0, 8 }
  0x3f   : > { %457 = vxpose.xlu0.b32.cont [2/4] (short) (narrow) %v270_v7, 8 }
  0x43   : > { %458 = vxpose.xlu0.b32.cont [3/4] (short) (narrow) %v271_v8, 8 }
  0x47   : > { %459 = vxpose.xlu0.b32.end [4/4] (short) (narrow) %v272_v9, 8 }
  0x98   : > { %v386_v12 = vpop.permute.xlu0 %385  ;;  %v396_v13 = vpop.permute.xlu1 %395 }
  0x9c   : > { %v391_v15 = vpop.permute.xlu0 %390  ;;  %v401_v25 = vpop.permute.xlu1 %400 }
  0xbb   : > { %v472_v56 = vpop.trf.xlu0 }
  0xfb   : > { %v812_v14 = vpop.f32.mrb[0].mxu0 }
  0xfc   : > { %v380_v16 = vmul.f32 2.0, %v812_v14  ;;  %v360_v17 = vpop.f32.mrb[1].mxu0 }
  0xfd   : > { %v379_v18 = vmul.f32 2.0, %v360_v17 }
  0xfe   : > { %v404_v19 = vsub.f32 %v391_v15, %v380_v16 }
  0xff   : > { %v403_v20 = vsub.f32 %v386_v12, %v379_v18  ;;  %v815_v21 = vpop.f32.mrb[2].mxu0 }
 0x100   : > { %v382_v22 = vmul.f32 2.0, %v815_v21  ;;  %v370_v23 = vpop.f32.mrb[3].mxu0 }
 0x101   : > { %v407_v24 = vmin.f32 %v403_v20, %v404_v19  ;;  %v381_v26 = vmul.f32 2.0, %v370_v23 }
 0x102   : > { %v406_v27 = vsub.f32 %v401_v25, %v382_v22 }
 0x103   : > { %v405_v28 = vsub.f32 %v396_v13, %v381_v26 }
 0x105   : > { %v408_v29 = vmin.f32 %v405_v28, %v406_v27 }
 0x107   : > { %v409_v30 = vmin.f32 %v407_v24, %v408_v29 }
 0x109   : > { %v410_v31 = vrot.slane %v409_v30, 4 }
 0x10b   : > { %v411_v33 = vmin.f32 %v409_v30, %v410_v31 }
 0x10d   : > { %v412_v34 = vrot.slane %v411_v33, 2 }
 0x10f   : > { %v413_v36 = vmin.f32 %v411_v33, %v412_v34 }
 0x111   : > { %v414_v37 = vrot.slane %v413_v36, 1 }
 0x113   : > { %v415_v41 = vmin.f32 %v413_v36, %v414_v37 }
 0x115   : > { %vm423_vm3 = vcmp.eq.f32.partialorder %v405_v28, %v415_v41  ;;  %vm424_vm4 = vcmp.eq.f32.partialorder %v406_v27, %v415_v41  ;;  %vm421_vm5 = vcmp.eq.f32.partialorder %v403_v20, %v415_v41  ;;  %vm422_vm6 = vcmp.eq.f32.partialorder %v404_v19, %v415_v41 }
 0x116   : > { %v427_v42 = vsel %vm423_vm3, %v419_v38, 32  ;;  %v428_v43 = vsel %vm424_vm4, %v420_v39, 32  ;;  %v425_v44 = vsel %vm421_vm5, %v417_v35, 32  ;;  %v426_v45 = vsel %vm422_vm6, %v418_v40, 32 }
 0x117   : > { %vm431_vm7 = vcmp.lt.s32.totalorder %v427_v42, %v428_v43  ;;  %vm429_vm8 = vcmp.lt.s32.totalorder %v425_v44, %v426_v45  ;;  %vm488_vm4 = vcmask 261120  }
 0x118   : > { %v432_v46 = vsel %vm431_vm7, %v427_v42, %v428_v43  ;;  %v430_v47 = vsel %vm429_vm8, %v425_v44, %v426_v45 }
 0x119   : > { %vm433_vm9 = vcmp.lt.s32.totalorder %v430_v47, %v432_v46 }
 0x11a   : > { %v434_v48 = vsel %vm433_vm9, %v430_v47, %v432_v46 }
 0x11b   : > { %v435_v49 = vrot.slane %v434_v48, 4 }
 0x11d   : > { %vm436_vm10 = vcmp.lt.s32.totalorder %v434_v48, %v435_v49 }
 0x11e   : > { %v437_v50 = vsel %vm436_vm10, %v434_v48, %v435_v49 }
 0x11f   : > { %v438_v51 = vrot.slane %v437_v50, 2 }
 0x121   : > { %vm439_vm11 = vcmp.lt.s32.totalorder %v437_v50, %v438_v51 }
 0x122   : > { %v440_v52 = vsel %vm439_vm11, %v437_v50, %v438_v51 }
 0x123   : > { %v441_v53 = vrot.slane %v440_v52, 1 }
 0x125   : > { %vm442_vm12 = vcmp.lt.s32.totalorder %v440_v52, %v441_v53 }
 0x126   : > { %v443_v54 = vsel %vm442_vm12, %v440_v52, %v441_v53 }
 0x127   : > { %vm444_vm13 = vcmp.eq.s32.totalorder %v417_v35, %v443_v54  ;;  %vm445_vm14 = vcmp.eq.s32.totalorder %v418_v40, %v443_v54  ;;  %563 = vst [vmem:[%s253_s9] sm:$0x1] %v443_v54  ;;  %vm446_vm0 = vcmp.eq.s32.totalorder %v419_v38, %v443_v54  ;;  %vm447_vm2 = vcmp.eq.s32.totalorder %v420_v39, %v443_v54 }
 0x128   : > { %vm828_vm15 = vmpackc.low %vm445_vm14, %vm444_vm13 }
 0x129   : > { %829 = vmatpush3.bf16.msk.msra.mxu1 %vm828_vm15, %v1083_v55  ;;  %vm831_vm3 = vmpackc.low %vm447_vm2, %vm446_vm0 }
 0x12a   : > { %830 = vmatprep.subr.bf16.mxu1 %v1080_v10 }
 0x12d   : > { %832 = vmatpush3.bf16.msk.msra.mxu1 %vm831_vm3, %v1083_v55 }
 0x130   : > { %825 = vmatmul.mubr.msk.f32.vlgmr.msra.gmra.mrb[0].mxu1 %vm488_vm4, %v472_v56 }
 0x203   : > { %v558_v57 = vpop.f32.mrb[0].mxu1 }
 0x204   : > { %562 = vst [vmem:[%s1240_s13] sm:$0xf] %v558_v57  ;;  %v564_v58 = vsub.f32 %v558_v57, %v1215_v6  ;;  %v826_v59 = vpop.f32.mrb[1].mxu1 }
 0x206   : > { %v565_v60 = vmul.f32 %v564_v58, %v564_v58 }
 0x208   : > { %v566_v61 = vsel %vm290_vm1, %v565_v60, 0.0 }
 0x209   : > { %567 = vadd.xlane.f32.xlu1 %v566_v61 }
 0x20a   : > { %936 = shalt.err (!%p933_p7)
}
 0x20b   : > { %s937_s9 = scalar_lea.hbm %s1259_s26, 16  ;;  %s941_s10 = scalar_lea.hbm %s1373_s4, 64 }
 0x20c   : > { %p938_p9 = scmp.ne.s32.totalorder %s1259_s26, %s937_s9  ;;  %p942_p12 = scmp.lt.u32.totalorder %s1259_s26, %s1373_s4 }
 0x20d   : > { %p943_p13 = scmp.lt.u32.totalorder %s941_s10, %s937_s9  ;;  %p945_p1 = scmp.lt.u32.totalorder %s937_s9, %s1259_s26 }
 0x20e   : > { %p939_p10 = pnand %p938_p9, %p1170_p3 }
 0x20f   : > { %p944_p0 = por %p943_p13, %p942_p12 }
 0x210   : > { %p940_p11 = pneg %p939_p10 }
 0x211   : > { %p946_p2 = por %p945_p1, %p944_p0 }
 0x213   : > { %p947_p4 = pnand %p946_p2, %p940_p11 }
 0x215   : > { %950 = shalt.err (!%p947_p4)
}
 0x216   : > { %836 = dma.vmem_to_hbm [thread:$0]  (%p1170_p3), %s618_s29, 16, %s1259_s26, %s584_s12  }
 0x217   : > { %s791_s0 = sshll.u32 %s1247_s15, 6  ;;  %s602_s14 = sshll.u32 %s1240_s13, 4  ;;  %s603_s14 = int_to_ptr.vmem [resolvable:$true] %s602_s14 }
 0x218   : > { %s1286_s10 = scalar_lea.hbm %s1372_s3, %s791_s0  ;;  %s579_s9 = scalar_lea.sflag [#allocation3], %s1235_s8 }
 0x219   : > { %s951_s21 = scalar_lea.vmem %s603_s14, 64  ;;  %s1085_s22 = smov [#allocation2]  }
 0x21a   : > { %p952_p5 = scmp.ne.s32.totalorder %s603_s14, %s951_s21  ;;  %s955_s30 = sshll.u32 %s1085_s22, 4  ;;  %s956_s30 = int_to_ptr.vmem [resolvable:$false] %s955_s30 }
 0x21b   : > { %s957_s1 = scalar_lea.vmem %s956_s30, 128  ;;  %p958_p9 = scmp.lt.s32.totalorder %s603_s14, %s956_s30 }
 0x21c   : > { %p953_p6 = pnand %p952_p5, %p1170_p3  ;;  %p959_p10 = scmp.lt.s32.totalorder %s957_s1, %s951_s21 }
 0x21e   : > { %p954_p7 = pneg %p953_p6  ;;  %p960_p11 = por %p959_p10, %p958_p9 }
 0x220   : > { %p961_p12 = pnand %p960_p11, %p954_p7 }
 0x222   : > { %964 = shalt.err (!%p961_p12)
}
 0x223   : > { %s965_s13 = scalar_lea.hbm %s1286_s10, 64  ;;  %s969_s0 = scalar_lea.hbm %s1372_s3, 256 }
 0x224   : > { %p966_p13 = scmp.ne.s32.totalorder %s1286_s10, %s965_s13  ;;  %p970_p2 = scmp.lt.u32.totalorder %s1286_s10, %s1372_s3 }
 0x225   : > { %p971_p4 = scmp.lt.u32.totalorder %s969_s0, %s965_s13  ;;  %p973_p6 = scmp.lt.u32.totalorder %s965_s13, %s1286_s10 }
 0x226   : > { %p967_p0 = pnand %p966_p13, %p1170_p3 }
 0x227   : > { %p972_p5 = por %p971_p4, %p970_p2 }
 0x228   : > { %p968_p1 = pneg %p967_p0 }
 0x229   : > { %p974_p7 = por %p973_p6, %p972_p5 }
 0x22b   : > { %p975_p9 = pnand %p974_p7, %p968_p1 }
 0x22d   : > { %978 = shalt.err (!%p975_p9)
}
 0x22e   : > { %835 = dma.vmem_to_hbm [thread:$0]  (%p1170_p3), %s603_s14, 64, %s1286_s10, %s579_s9  }
 0x22f   : > { %s259_s1 = scalar_lea.vmem [#allocation6], %s1235_s8  ;;  %s1387_s22 = sshll.u32 %s1247_s15, 4 }
 0x230   : > { %s632_s27 = sshll.u32 %s259_s1, 4  ;;  %s1314_s10 = scalar_lea.hbm %s1374_s5, %s1387_s22  ;;  %s1307_s27 = int_to_ptr.vmem [resolvable:$true] %s632_s27 }
 0x231   : > { %s979_s9 = scalar_lea.vmem %s1307_s27, 16  ;;  %s1086_s8 = smov [#allocation6]  }
 0x232   : > { %p980_p10 = scmp.ne.s32.totalorder %s1307_s27, %s979_s9  ;;  %s983_s26 = sshll.u32 %s1086_s8, 4  ;;  %s984_s26 = int_to_ptr.vmem [resolvable:$false] %s983_s26 }
 0x233   : > { %s985_s29 = scalar_lea.vmem %s984_s26, 32  ;;  %p986_p13 = scmp.lt.s32.totalorder %s1307_s27, %s984_s26 }
 0x234   : > { %p981_p11 = pnand %p980_p10, %p1170_p3  ;;  %p987_p0 = scmp.lt.s32.totalorder %s985_s29, %s979_s9 }
 0x236   : > { %p982_p12 = pneg %p981_p11  ;;  %p988_p1 = por %p987_p0, %p986_p13 }
 0x238   : > { %p989_p2 = pnand %p988_p1, %p982_p12 }
 0x296   : > { %v568_v62 = vpop.xlane.xlu1 %567 }
 0x297   : > { %v569_v63 = vrot.slane %v568_v62, 4 }
 0x299   : > { %v570_v0 = vadd.f32 %v569_v63, %v568_v62 }
 0x29b   : > { %v571_v1 = vrot.slane %v570_v0, 2 }
 0x29d   : > { %v572_v2 = vadd.f32 %v571_v1, %v570_v0 }
 0x29f   : > { %v573_v3 = vrot.slane %v572_v2, 1 }
 0x2a1   : > { %v574_v4 = vadd.f32 %v573_v3, %v572_v2 }
 0x2a3   : > { %833 = vpush %v574_v4 }
 0x2d4   : > { %s834_s21 = spop %833 }
 0x2d5   : > { %v576_v5 = vstv %s834_s21 }
 0x2d6   : > { %577 = vst [vmem:[%s259_s1] sm:$0x1] %v576_v5 }
 0x2d7   : > { %992 = shalt.err (!%p989_p2)
}
 0x2d8   : > { %s993_s15 = scalar_lea.hbm %s1314_s10, 16  ;;  %s997_s30 = scalar_lea.hbm %s1374_s5, 64 }
 0x2d9   : > { %p994_p4 = scmp.ne.s32.totalorder %s1314_s10, %s993_s15  ;;  %p998_p7 = scmp.lt.u32.totalorder %s1314_s10, %s1374_s5 }
 0x2da   : > { %p999_p9 = scmp.lt.u32.totalorder %s997_s30, %s993_s15  ;;  %p1001_p11 = scmp.lt.u32.totalorder %s993_s15, %s1314_s10 }
 0x2db   : > { %p995_p5 = pnand %p994_p4, %p1170_p3 }
 0x2dc   : > { %p1000_p10 = por %p999_p9, %p998_p7 }
 0x2dd   : > { %p996_p6 = pneg %p995_p5 }
 0x2de   : > { %p1002_p12 = por %p1001_p11, %p1000_p10 }
 0x2e0   : > { %p1003_p13 = pnand %p1002_p12, %p996_p6 }
 0x2e2   : > { %1006 = shalt.err (!%p1003_p13)
}
 0x2e3   : > { %837 = dma.vmem_to_hbm [thread:$0]  (%p1170_p3), %s1307_s27, 16, %s1314_s10, %s584_s12  }
 0x2e4 PF: > { %p851_p0 = scmp.ge.s32.totalorder %s1077_s25, 2  ;;  %s644_s22 = sand.u32 1, %s1049_s18  }
 0x2e5   : > { %s645_s13 = scalar_lea.sflag [#allocation3], %s644_s22 }
 0x2e6   : > { %p842_p1 = pnand %p851_p0, %p1181_p8 }
 0x2e8   : > { %1040 = dma.done.wait (!%p842_p1), %s645_s13, 64  }
 0x2e9   : > { %1042 = vsyncadd (!%p842_p1), %s645_s13, 4294967232  ;;  %s1388_s14 = sadd.s32 4294967294, %s1077_s25  }
 0x2ea   : > { %s653_s9 = sand.u32 1, %s1388_s14  }
 0x2eb   : > { %s654_s6 = scalar_lea.sflag [#allocation5], %s653_s9 }
 0x2ec   : > { %1044 = dma.done.wait (!%p842_p1), %s654_s6, 32  }
 0x2ed   : > { %1046 = vsyncadd (!%p842_p1), %s654_s6, 4294967264  ;;  %s22_s25 = sadd.s32 1, %s1077_s25   ;;  %s1389_s7 = sld [smem:[#allocation9_spill]] }
 0x2ee   : > { %p19_p3 = scmp.ge.s32.totalorder %s22_s25, 6   ;;  %s1390_s18 = smov %s1053_s19 }
 0x2ef   : > { %s1391_s19 = smov %s1057_s20  ;;  %s1392_s20 = smov %s1190_s11 }
 0x2f0   : > { %s1393_s21 = smov %s1069_s23  ;;  %s1394_s22 = smov %s1073_s24 }
 0x2f1   : > { %s1395_s23 = smov %s1398_s28  ;;  %21 = sbr.rel (!%p19_p3) target bundleno = 10 (0xa), region = 99 }
 0x2f3   : > { %s1396_s24 = smov %s1389_s7 }
 0x2f8   :  { %666 = vsyncpa [#allocation3], 1 }
 0x2f9   :  { %668 = vsyncpa [#allocation3 + $0x1], 1 }
 0x2fa   :  { %669 = vsyncpa [#allocation5], 1 }
 0x2fb   :  { %671 = vsyncpa [#allocation5 + $0x1], 1 }

</bundles_post_ra>
